<compile_context>
chip_gen: v7x
topology: tpu7x:2x2x1
jax: 0.10.0
libtpu: 0.0.40
codegen_flags: <defaults>
</compile_context>

<pallas_src>
import functools

import jax
import jax.numpy as jnp
from jax import lax
from jax.experimental import pallas as pl
from jax.experimental.pallas import tpu as pltpu

K_CHECK = 4        # check fixed-point convergence every K_CHECK iterations
N_FP_ITERS = 48    # cap on fixed-point iterations (multiple of K_CHECK)
FP_TOL = 1e-4      # convergence tolerance on max|h_{i+K} - h_i|


def rnn_kernel(x2d_ref, wih_ref, whh_ref, wlin_ref, out_ref, hn_ref, *,
               seq_len, batch_pad, hidden):
    # x2d_ref:  (S*Bp, I+1) f32   x flattened over (seq, padded batch), ones column appended
    # wih_ref:  (I+1, H)    f32   rows 0..I-1 = W_ih^T, row I = b_ih + b_hh
    # whh_ref:  (H, H)      f32   = W_hh^T
    # wlin_ref: (H+8, 2)    f32   rows 0..H-1 = W_linear^T, row H = b_linear, rest zero
    # out_ref:  (S*Bp, 2)   f32
    # hn_ref:   (Bp, H)     f32
    S, B, H = seq_len, batch_pad, hidden

    whh = whh_ref[...]                                    # (H, H) f32

    # ---- input projection for all timesteps in ONE MXU call (bias folded in) ----
    xproj = jnp.dot(x2d_ref[...], wih_ref[...],
                    preferred_element_type=jnp.float32)   # (S*Bp, H)
    xp0 = xproj[0:B, :]                                    # (Bp, H), sublane-aligned

    # ---- initial condition: fixed point  h = tanh(xp0 + h @ W_hh^T) ----
    # Picard iteration from zero; convergence checked once per K_CHECK steps so the
    # cross-lane reduce + scalar branch is off the per-iteration critical path.
    def fp_cond(carry):
        i, _, diff = carry
        return jnp.logical_and(i < N_FP_ITERS, diff > FP_TOL)

    def fp_body(carry):
        i, h, _ = carry
        h_prev = h
        for _ in range(K_CHECK):
            h = jnp.tanh(xp0 + jnp.dot(h, whh, preferred_element_type=jnp.float32))
        return i + K_CHECK, h, jnp.max(jnp.abs(h - h_prev))

    _, h, _ = lax.while_loop(
        fp_cond, fp_body,
        (jnp.int32(0),
         jnp.zeros((B, H), jnp.float32),
         jnp.array(jnp.inf, dtype=jnp.float32)))

    # ---- RNN recurrence, fully unrolled (S small & static) ----
    hs = []
    for t in range(S):
        h = jnp.tanh(xproj[t * B:(t + 1) * B, :]
                     + jnp.dot(h, whh, preferred_element_type=jnp.float32))
        hs.append(h)
    hn_ref[...] = h

    # ---- linear head: ONE fused matmul + ONE store (off the serial path) ----
    hs_all = jnp.concatenate(hs, axis=0)                   # (S*Bp, H)
    w_all = wlin_ref[...]                                  # (H+8, 2)
    out_ref[...] = (jnp.dot(hs_all, w_all[:H, :],
                            preferred_element_type=jnp.float32)
                    + w_all[H:H + 1, :])


def rnn_forward(x, w_ih, w_hh, b_ih, b_hh, w_lin, b_lin):
    """x: (S, B, I) f32. Returns (output (S, B, 2), hn (1, B, H))."""
    S, B, I = x.shape
    H = w_hh.shape[0]
    B_pad = max(8, ((B + 7) // 8) * 8)   # sublane-align the batch dimension

    # NOTE: all weight packing below is static w.r.t. the parameters and can be
    # hoisted out of the hot path when weights do not change between calls.
    x_f = jnp.asarray(x, jnp.float32)
    if B_pad != B:
        x_f = jnp.pad(x_f, ((0, 0), (0, B_pad - B), (0, 0)))
    x2d = x_f.reshape(S * B_pad, I)
    x2d_aug = jnp.concatenate(
        [x2d, jnp.ones((S * B_pad, 1), jnp.float32)], axis=1)          # (S*Bp, I+1)

    bias = (jnp.asarray(b_ih, jnp.float32)
            + jnp.asarray(b_hh, jnp.float32)).reshape(1, H)
    wih_aug = jnp.concatenate(
        [jnp.asarray(w_ih, jnp.float32).T, bias], axis=0)              # (I+1, H)
    whh_t = jnp.asarray(w_hh, jnp.float32).T                           # (H, H)

    wlin_pack = jnp.zeros((H + 8, 2), jnp.float32)
    wlin_pack = wlin_pack.at[:H].set(jnp.asarray(w_lin, jnp.float32).T)
    wlin_pack = wlin_pack.at[H].set(jnp.asarray(b_lin, jnp.float32))   # (H+8, 2)

    vmem = pl.BlockSpec(memory_space=pltpu.MemorySpace.VMEM)
    out2d, hn_pad = pl.pallas_call(
        functools.partial(rnn_kernel, seq_len=S, batch_pad=B_pad, hidden=H),
        out_shape=(
            jax.ShapeDtypeStruct((S * B_pad, 2), jnp.float32),
            jax.ShapeDtypeStruct((B_pad, H), jnp.float32),
        ),
        in_specs=[vmem] * 4,
        out_specs=(vmem, vmem),
    )(x2d_aug, wih_aug, whh_t, wlin_pack)

    out = out2d.reshape(S, B_pad, 2)[:, :B, :]
    hn = hn_pad[:B][None, :, :]
    return out, hn


if __name__ == "__main__":
    # Small shapes consistent with the module: seq=8, batch=4, input=16, hidden=32.
    input_size, hidden_size, seq_len, batch = 16, 32, 8, 4

    key = jax.random.PRNGKey(0)
    kx, k1, k2, k3, k4, k5, k6 = jax.random.split(key, 7)

    # Deterministic parameter init, mimicking PyTorch's U(-1/sqrt(H), 1/sqrt(H)).
    bound = 1.0 / jnp.sqrt(jnp.float32(hidden_size))
    w_ih = jax.random.uniform(k1, (hidden_size, input_size), jnp.float32, -bound, bound)
    w_hh = jax.random.uniform(k2, (hidden_size, hidden_size), jnp.float32, -bound, bound)
    b_ih = jax.random.uniform(k3, (hidden_size,), jnp.float32, -bound, bound)
    b_hh = jax.random.uniform(k4, (hidden_size,), jnp.float32, -bound, bound)
    w_lin = jax.random.uniform(k5, (2, hidden_size), jnp.float32, -bound, bound)
    b_lin = jax.random.uniform(k6, (2,), jnp.float32, -bound, bound)

    x = jax.random.normal(kx, (seq_len, batch, input_size), jnp.float32)

    forward = jax.jit(rnn_forward)
    output, hn = forward(x, w_ih, w_hh, b_ih, b_hh, w_lin, b_lin)
    jax.block_until_ready((output, hn))

    assert output.shape == (seq_len, batch, 2)
    assert hn.shape == (1, batch, hidden_size)
    assert bool(jnp.all(jnp.isfinite(output))) and bool(jnp.all(jnp.isfinite(hn)))
    print("KERNEL_OK")
</pallas_src>

<mosaic_0001>
module attributes {stable_mosaic.version = 11 : i64} {
  func.func @rnn_kernel(%arg0: memref<64x17xf32, #tpu.memory_space<vmem>>, %arg1: memref<17x32xf32, #tpu.memory_space<vmem>>, %arg2: memref<32x32xf32, #tpu.memory_space<vmem>>, %arg3: memref<40x2xf32, #tpu.memory_space<vmem>>, %arg4: memref<64x2xf32, #tpu.memory_space<vmem>>, %arg5: memref<8x32xf32, #tpu.memory_space<vmem>>) attributes {dimension_semantics = [], scalar_prefetch = 0 : i64, scratch_operands = 0 : i64, tpu.core_type = #tpu.core_type<tc>} {
    %c0 = arith.constant 0 : index
    %c0_0 = arith.constant 0 : index
    %0 = vector.load %arg2[%c0, %c0_0] : memref<32x32xf32, #tpu.memory_space<vmem>>, vector<32x32xf32>
    %c0_1 = arith.constant 0 : index
    %c0_2 = arith.constant 0 : index
    %1 = vector.load %arg0[%c0_1, %c0_2] : memref<64x17xf32, #tpu.memory_space<vmem>>, vector<64x17xf32>
    %c0_3 = arith.constant 0 : index
    %c0_4 = arith.constant 0 : index
    %2 = vector.load %arg1[%c0_3, %c0_4] : memref<17x32xf32, #tpu.memory_space<vmem>>, vector<17x32xf32>
    %cst = arith.constant dense<0.000000e+00> : vector<64x32xf32>
    %3 = tpu.matmul %1, %2, %cst {dimension_numbers = #tpu.dot_dimension_numbers<[1], [0], [0], [1], [0, 0, 1, 1], [], []>} : vector<64x17xf32>, vector<17x32xf32>, vector<64x32xf32> -> vector<64x32xf32>
    %4 = vector.extract_strided_slice %3 {offsets = [0, 0], sizes = [8, 32], strides = [1, 1]} : vector<64x32xf32> to vector<8x32xf32>
    %cst_5 = arith.constant 0.000000e+00 : f32
    %5 = vector.broadcast %cst_5 : f32 to vector<8x32xf32>
    %c0_i32 = arith.constant 0 : i32
    %cst_6 = arith.constant 0x7F800000 : f32
    %6:3 = scf.while (%arg6 = %c0_i32, %arg7 = %5, %arg8 = %cst_6) : (i32, vector<8x32xf32>, f32) -> (i32, vector<8x32xf32>, f32) {
      %c48_i32 = arith.constant 48 : i32
      %48 = arith.cmpi slt, %arg6, %c48_i32 : i32
      %cst_22 = arith.constant 9.99999974E-5 : f32
      %49 = arith.cmpf ogt, %arg8, %cst_22 : f32
      %50 = arith.andi %48, %49 : i1
      scf.condition(%50) %arg6, %arg7, %arg8 : i32, vector<8x32xf32>, f32
    } do {
    ^bb0(%arg6: i32, %arg7: vector<8x32xf32>, %arg8: f32):
      %cst_22 = arith.constant dense<0.000000e+00> : vector<8x32xf32>
      %48 = tpu.matmul %arg7, %0, %cst_22 {dimension_numbers = #tpu.dot_dimension_numbers<[1], [0], [0], [1], [0, 0, 1, 1], [], []>} : vector<8x32xf32>, vector<32x32xf32>, vector<8x32xf32> -> vector<8x32xf32>
      %49 = arith.addf %4, %48 : vector<8x32xf32>
      %50 = math.tanh %49 : vector<8x32xf32>
      %cst_23 = arith.constant dense<0.000000e+00> : vector<8x32xf32>
      %51 = tpu.matmul %50, %0, %cst_23 {dimension_numbers = #tpu.dot_dimension_numbers<[1], [0], [0], [1], [0, 0, 1, 1], [], []>} : vector<8x32xf32>, vector<32x32xf32>, vector<8x32xf32> -> vector<8x32xf32>
      %52 = arith.addf %4, %51 : vector<8x32xf32>
      %53 = math.tanh %52 : vector<8x32xf32>
      %cst_24 = arith.constant dense<0.000000e+00> : vector<8x32xf32>
      %54 = tpu.matmul %53, %0, %cst_24 {dimension_numbers = #tpu.dot_dimension_numbers<[1], [0], [0], [1], [0, 0, 1, 1], [], []>} : vector<8x32xf32>, vector<32x32xf32>, vector<8x32xf32> -> vector<8x32xf32>
      %55 = arith.addf %4, %54 : vector<8x32xf32>
      %56 = math.tanh %55 : vector<8x32xf32>
      %cst_25 = arith.constant dense<0.000000e+00> : vector<8x32xf32>
      %57 = tpu.matmul %56, %0, %cst_25 {dimension_numbers = #tpu.dot_dimension_numbers<[1], [0], [0], [1], [0, 0, 1, 1], [], []>} : vector<8x32xf32>, vector<32x32xf32>, vector<8x32xf32> -> vector<8x32xf32>
      %58 = arith.addf %4, %57 : vector<8x32xf32>
      %59 = math.tanh %58 : vector<8x32xf32>
      %c4_i32 = arith.constant 4 : i32
      %60 = arith.addi %arg6, %c4_i32 : i32
      %61 = arith.subf %59, %arg7 : vector<8x32xf32>
      %62 = math.absf %61 : vector<8x32xf32>
      %63 = vector.shape_cast %62 : vector<8x32xf32> to vector<1x8x32xf32>
      %cst_26 = arith.constant dense<0xFF800000> : vector<1xf32>
      %64 = vector.multi_reduction <maximumf>, %63, %cst_26 [1, 2] : vector<1x8x32xf32> to vector<1xf32>
      %65 = vector.shape_cast %64 : vector<1xf32> to vector<1x1x1xf32>
      %66 = vector.extract %65[0, 0, 0] : f32 from vector<1x1x1xf32>
      scf.yield %60, %59, %66 : i32, vector<8x32xf32>, f32
    }
    %7 = vector.extract_strided_slice %3 {offsets = [0, 0], sizes = [8, 32], strides = [1, 1]} : vector<64x32xf32> to vector<8x32xf32>
    %cst_7 = arith.constant dense<0.000000e+00> : vector<8x32xf32>
    %8 = tpu.matmul %6#1, %0, %cst_7 {dimension_numbers = #tpu.dot_dimension_numbers<[1], [0], [0], [1], [0, 0, 1, 1], [], []>} : vector<8x32xf32>, vector<32x32xf32>, vector<8x32xf32> -> vector<8x32xf32>
    %9 = arith.addf %7, %8 : vector<8x32xf32>
    %10 = math.tanh %9 : vector<8x32xf32>
    %11 = vector.extract_strided_slice %3 {offsets = [8, 0], sizes = [8, 32], strides = [1, 1]} : vector<64x32xf32> to vector<8x32xf32>
    %cst_8 = arith.constant dense<0.000000e+00> : vector<8x32xf32>
    %12 = tpu.matmul %10, %0, %cst_8 {dimension_numbers = #tpu.dot_dimension_numbers<[1], [0], [0], [1], [0, 0, 1, 1], [], []>} : vector<8x32xf32>, vector<32x32xf32>, vector<8x32xf32> -> vector<8x32xf32>
    %13 = arith.addf %11, %12 : vector<8x32xf32>
    %14 = math.tanh %13 : vector<8x32xf32>
    %15 = vector.extract_strided_slice %3 {offsets = [16, 0], sizes = [8, 32], strides = [1, 1]} : vector<64x32xf32> to vector<8x32xf32>
    %cst_9 = arith.constant dense<0.000000e+00> : vector<8x32xf32>
    %16 = tpu.matmul %14, %0, %cst_9 {dimension_numbers = #tpu.dot_dimension_numbers<[1], [0], [0], [1], [0, 0, 1, 1], [], []>} : vector<8x32xf32>, vector<32x32xf32>, vector<8x32xf32> -> vector<8x32xf32>
    %17 = arith.addf %15, %16 : vector<8x32xf32>
    %18 = math.tanh %17 : vector<8x32xf32>
    %19 = vector.extract_strided_slice %3 {offsets = [24, 0], sizes = [8, 32], strides = [1, 1]} : vector<64x32xf32> to vector<8x32xf32>
    %cst_10 = arith.constant dense<0.000000e+00> : vector<8x32xf32>
    %20 = tpu.matmul %18, %0, %cst_10 {dimension_numbers = #tpu.dot_dimension_numbers<[1], [0], [0], [1], [0, 0, 1, 1], [], []>} : vector<8x32xf32>, vector<32x32xf32>, vector<8x32xf32> -> vector<8x32xf32>
    %21 = arith.addf %19, %20 : vector<8x32xf32>
    %22 = math.tanh %21 : vector<8x32xf32>
    %23 = vector.extract_strided_slice %3 {offsets = [32, 0], sizes = [8, 32], strides = [1, 1]} : vector<64x32xf32> to vector<8x32xf32>
    %cst_11 = arith.constant dense<0.000000e+00> : vector<8x32xf32>
    %24 = tpu.matmul %22, %0, %cst_11 {dimension_numbers = #tpu.dot_dimension_numbers<[1], [0], [0], [1], [0, 0, 1, 1], [], []>} : vector<8x32xf32>, vector<32x32xf32>, vector<8x32xf32> -> vector<8x32xf32>
    %25 = arith.addf %23, %24 : vector<8x32xf32>
    %26 = math.tanh %25 : vector<8x32xf32>
    %27 = vector.extract_strided_slice %3 {offsets = [40, 0], sizes = [8, 32], strides = [1, 1]} : vector<64x32xf32> to vector<8x32xf32>
    %cst_12 = arith.constant dense<0.000000e+00> : vector<8x32xf32>
    %28 = tpu.matmul %26, %0, %cst_12 {dimension_numbers = #tpu.dot_dimension_numbers<[1], [0], [0], [1], [0, 0, 1, 1], [], []>} : vector<8x32xf32>, vector<32x32xf32>, vector<8x32xf32> -> vector<8x32xf32>
    %29 = arith.addf %27, %28 : vector<8x32xf32>
    %30 = math.tanh %29 : vector<8x32xf32>
    %31 = vector.extract_strided_slice %3 {offsets = [48, 0], sizes = [8, 32], strides = [1, 1]} : vector<64x32xf32> to vector<8x32xf32>
    %cst_13 = arith.constant dense<0.000000e+00> : vector<8x32xf32>
    %32 = tpu.matmul %30, %0, %cst_13 {dimension_numbers = #tpu.dot_dimension_numbers<[1], [0], [0], [1], [0, 0, 1, 1], [], []>} : vector<8x32xf32>, vector<32x32xf32>, vector<8x32xf32> -> vector<8x32xf32>
    %33 = arith.addf %31, %32 : vector<8x32xf32>
    %34 = math.tanh %33 : vector<8x32xf32>
    %35 = vector.extract_strided_slice %3 {offsets = [56, 0], sizes = [8, 32], strides = [1, 1]} : vector<64x32xf32> to vector<8x32xf32>
    %cst_14 = arith.constant dense<0.000000e+00> : vector<8x32xf32>
    %36 = tpu.matmul %34, %0, %cst_14 {dimension_numbers = #tpu.dot_dimension_numbers<[1], [0], [0], [1], [0, 0, 1, 1], [], []>} : vector<8x32xf32>, vector<32x32xf32>, vector<8x32xf32> -> vector<8x32xf32>
    %37 = arith.addf %35, %36 : vector<8x32xf32>
    %38 = math.tanh %37 : vector<8x32xf32>
    %c0_15 = arith.constant 0 : index
    %c0_16 = arith.constant 0 : index
    %39 = vector.load %arg5[%c0_15, %c0_16] : memref<8x32xf32, #tpu.memory_space<vmem>>, vector<8x32xf32>
    tpu.vector_store %arg5[%c0_15, %c0_16], %38 {strides = array<i32>} : memref<8x32xf32, #tpu.memory_space<vmem>>, vector<8x32xf32>,
    %40 = tpu.concatenate %10, %14, %18, %22, %26, %30, %34, %38 in 0 : vector<8x32xf32>, vector<8x32xf32>, vector<8x32xf32>, vector<8x32xf32>, vector<8x32xf32>, vector<8x32xf32>, vector<8x32xf32>, vector<8x32xf32> -> vector<64x32xf32>
    %c0_17 = arith.constant 0 : index
    %c0_18 = arith.constant 0 : index
    %41 = vector.load %arg3[%c0_17, %c0_18] : memref<40x2xf32, #tpu.memory_space<vmem>>, vector<40x2xf32>
    %42 = vector.extract_strided_slice %41 {offsets = [0, 0], sizes = [32, 2], strides = [1, 1]} : vector<40x2xf32> to vector<32x2xf32>
    %cst_19 = arith.constant dense<0.000000e+00> : vector<64x2xf32>
    %43 = tpu.matmul %40, %42, %cst_19 {dimension_numbers = #tpu.dot_dimension_numbers<[1], [0], [0], [1], [0, 0, 1, 1], [], []>} : vector<64x32xf32>, vector<32x2xf32>, vector<64x2xf32> -> vector<64x2xf32>
    %44 = vector.extract_strided_slice %41 {offsets = [32, 0], sizes = [1, 2], strides = [1, 1]} : vector<40x2xf32> to vector<1x2xf32>
    %45 = vector.broadcast %44 : vector<1x2xf32> to vector<64x2xf32>
    %46 = arith.addf %43, %45 : vector<64x2xf32>
    %c0_20 = arith.constant 0 : index
    %c0_21 = arith.constant 0 : index
    %47 = vector.load %arg4[%c0_20, %c0_21] : memref<64x2xf32, #tpu.memory_space<vmem>>, vector<64x2xf32>
    tpu.vector_store %arg4[%c0_20, %c0_21], %46 {strides = array<i32>} : memref<64x2xf32, #tpu.memory_space<vmem>>, vector<64x2xf32>,
    return
  }
}

</mosaic_0001>

<bundles_post_ra>
// kernel: rnn_forward.1
= control target key start
LH: loop header
LB: loop body
LE: loop exit
PB: predicated region body
PF: predicated region fallthrough
CT: control target
= control target key end

     0   :  { %vm34_vm0 = vcmask 138240   ;;  %vm59_vm1 = vcmask 1040384   ;;  %v1786_v24 = vmov 0.0   ;;  %s1955_s1 = inlined_call_operand.vmem [shape: f32[17,32], index: 1, kind: input, shape index: {}]   ;;  %s1956_s2 = inlined_call_operand.vmem [shape: f32[32,32], index: 2, kind: input, shape index: {}]   ;;  %s1957_s3 = inlined_call_operand.vmem [shape: f32[40,2], index: 3, kind: input, shape index: {}]   ;;  %s1958_s4 = inlined_call_operand.vmem [shape: f32[64,2], index: 4, kind: output, shape index: {0}]   ;;  %s1959_s5 = inlined_call_operand.vmem [shape: f32[8,32], index: 5, kind: output, shape index: {1}]   ;;  %s1960_s0 = inlined_call_operand.vmem [shape: f32[64,17], index: 0, kind: input, shape index: {}]  }
   0x1   :  { %v1712_v0 = vld [vmem:[%s1956_s2] sm:$0xff]  ;;  %v1717_v1 = vld [vmem:[%s1956_s2 + $0x8] sm:$0xff]  ;;  %v1722_v2 = vld [vmem:[%s1956_s2 + $0x10] sm:$0xff] }
   0x2   :  { %v1727_v3 = vld [vmem:[%s1956_s2 + $0x18] sm:$0xff]  ;;  %v31_v4 = vld [vmem:[%s1955_s1] sm:$0xff]  ;;  %v32_v5 = vld [vmem:[%s1955_s1 + $0x8] sm:$0xff] }
   0x3   :  { %v1521_v6 = vpack.c.bf16 %v32_v5, %v31_v4  ;;  %v23_v7 = vld [vmem:[%s1960_s0] sm:$0xff]  ;;  %v33_v9 = vld [vmem:[%s1955_s1 + $0x10] sm:$0x1]  ;;  %v24_v10 = vld [vmem:[%s1960_s0 + $0x8] sm:$0xff] }
   0x4   :  { %v27_v8 = vld [vmem:[%s1960_s0 + $0x20] sm:$0xff]  ;;  %1357 = vmatprep.mubr.msk.f32.mxu0 %vm34_vm0, %v23_v7  ;;  %v28_v11 = vld [vmem:[%s1960_s0 + $0x28] sm:$0xff]  ;;  %v25_v12 = vld [vmem:[%s1960_s0 + $0x10] sm:$0xff] }
   0x5   :  { %1363 = vmatprep.mubr.msk.f32.mxu1 %vm34_vm0, %v27_v8  ;;  %1522 = vmatprep.subr.bf16.mxu0 %v1521_v6  ;;  %v29_v13 = vld [vmem:[%s1960_s0 + $0x30] sm:$0xff]  ;;  %v26_v14 = vld [vmem:[%s1960_s0 + $0x18] sm:$0xff] }
   0x6   :  { %1605 = vmatprep.subr.bf16.mxu1 %v1521_v6  ;;  %1524 = vmatpush3.bf16.msra.mxu0 %v1521_v6  ;;  %v30_v15 = vld [vmem:[%s1960_s0 + $0x38] sm:$0xff]  ;;  %s1788_s0 = smov 0  }
   0x7   :  { %1607 = vmatpush3.bf16.msra.mxu1 %v1521_v6  ;;  %1355 = vmatprep.subr.msk.mxu0 %vm59_vm1, %v33_v9 }
   0x8   :  { %1606 = vmatprep.subr.msk.mxu1 %vm59_vm1, %v33_v9 }
   0xa   :  { %1356 = vmatpush3.msk.msra.mxu0 %vm59_vm1, %v33_v9 }
   0xb   :  { %1608 = vmatpush3.msk.msra.mxu1 %vm59_vm1, %v33_v9  ;;  %1358 = vmatmul.mubr.msk.f32.vlgmr.msra.gmra.mrb[0].mxu0 %vm34_vm0, %v24_v10 }
   0xc   :  { %1364 = vmatmul.mubr.msk.f32.vlgmr.msra.gmra.mrb[0].mxu1 %vm34_vm0, %v28_v11  ;;  %1360 = vmatprep.mubr.msk.f32.mxu0 %vm34_vm0, %v25_v12 }
   0xd   :  { %1366 = vmatprep.mubr.msk.f32.mxu1 %vm34_vm0, %v29_v13 }
   0xf   :  { %1361 = vmatmul.mubr.msk.f32.gmra.mrb[2].mxu0 %vm34_vm0, %v26_v14 }
  0x10   :  { %1367 = vmatmul.mubr.msk.f32.gmra.mrb[2].mxu1 %vm34_vm0, %v30_v15 }
  0xde   :  { %v1770_v16 = vpop.f32.mrb[0].mxu0 }
  0xdf   :  { %v1772_v17 = vpop.f32.mrb[0].mxu1  ;;  %v1774_v18 = vpop.f32.mrb[1].mxu0 }
  0xe0   :  { %v1776_v19 = vpop.f32.mrb[1].mxu1 }
  0xe2   :  { %v1778_v20 = vpop.f32.mrb[2].mxu0 }
  0xe3   :  { %v1780_v21 = vpop.f32.mrb[2].mxu1  ;;  %v1782_v22 = vpop.f32.mrb[3].mxu0 }
  0xe4   :  { %v1784_v23 = vpop.f32.mrb[3].mxu1 }
  0xe5 LB: > { %v1796_v25 = vpack.c.bf16 %v1717_v1, %v1712_v0  ;;  %v1673_v26 = vmov 0.0|0.0   ;;  %v1801_v27 = vpack.c.bf16 %v1727_v3, %v1722_v2  ;;  %vm1674_vm2 = vmmov 0   ;;  %s479_s0 = sadd.s32 4, %s1671_s0   ;;  %s1671_s0 = sphi %s1788_s0, %s479_s0   ;;  %v1667_v24 = vphi %v1786_v24, %v1961_v24  }
  0xe6   : > { %1525 = vmatprep.subr.bf16.mxu0 %v1673_v26  ;;  %1531 = vmatprep.subr.bf16.mxu1 %v1673_v26  ;;  %v1675_v28 = vmov 0.0   ;;  %vm178_vm3 = vcmask 261120   ;;  %p172_p0 = scmp.lt.s32.totalorder %s479_s0, 48 }
  0xe7   : > { %1527 = vmatpush3.bf16.msra.mxu0 %v1796_v25  ;;  %1377 = vmatprep.mubr.msk.f32.mxu0 %vm1674_vm2, %v1675_v28 }
  0xe8   : > { %1528 = vmatprep.subr.bf16.mxu0 %v1673_v26  ;;  %1533 = vmatpush3.bf16.msra.mxu1 %v1796_v25 }
  0xe9   : > { %1534 = vmatprep.subr.bf16.mxu1 %v1673_v26  ;;  %1388 = vmatprep.mubr.msk.f32.mxu1 %vm1674_vm2, %v1675_v28 }
  0xeb   : > { %1530 = vmatpush3.bf16.msra.mxu0 %v1801_v27 }
  0xec   : > { %1536 = vmatpush3.bf16.msra.mxu1 %v1801_v27  ;;  %1537 = vmatprep.subr.bf16.mxu0 %v1673_v26 }
  0xed   : > { %1543 = vmatprep.subr.bf16.mxu1 %v1673_v26 }
  0xee   : > { %1378 = vmatmul.mubr.msk.f32.vlgmr.msra.gmra.mrb[0].mxu0 %vm178_vm3, %v1667_v24 }
  0xef   : > { %1539 = vmatpush3.bf16.msra.mxu0 %v1796_v25  ;;  %1399 = vmatprep.mubr.msk.f32.mxu0 %vm1674_vm2, %v1675_v28 }
  0xf0   : > { %1540 = vmatprep.subr.bf16.mxu0 %v1673_v26 }
  0xf3   : > { %1542 = vmatpush3.bf16.msra.mxu0 %v1801_v27 }
 0x1c1   : > { %v248_v29 = vpop.f32.mrb[0].mxu0 }
 0x1c2   : > { %v252_v30 = vadd.f32 %v248_v29, %v1774_v18  ;;  %v1379_v31 = vpop.f32.mrb[1].mxu0 }
 0x1c4   : > { %1633 = vtanh.f32 %v252_v30 }
 0x1ce   : > { %v1634_v32 = vpop.eup %1633 }
 0x1cf   : > { %1389 = vmatmul.mubr.msk.f32.vlgmr.msra.gmra.mrb[0].mxu1 %vm178_vm3, %v1634_v32 }
 0x1d0   : > { %1545 = vmatpush3.bf16.msra.mxu1 %v1796_v25  ;;  %1410 = vmatprep.mubr.msk.f32.mxu1 %vm1674_vm2, %v1675_v28 }
 0x1d1   : > { %1546 = vmatprep.subr.bf16.mxu1 %v1673_v26 }
 0x1d4   : > { %1548 = vmatpush3.bf16.msra.mxu1 %v1801_v27 }
 0x2a2   : > { %v323_v33 = vpop.f32.mrb[0].mxu1 }
 0x2a3   : > { %v327_v34 = vadd.f32 %v323_v33, %v1774_v18  ;;  %v1390_v35 = vpop.f32.mrb[1].mxu1 }
 0x2a5   : > { %1635 = vtanh.f32 %v327_v34 }
 0x2af   : > { %v1636_v36 = vpop.eup %1635 }
 0x2b0   : > { %1400 = vmatmul.mubr.msk.f32.vlgmr.msra.gmra.mrb[2].mxu0 %vm178_vm3, %v1636_v36 }
 0x383   : > { %v398_v37 = vpop.f32.mrb[2].mxu0 }
 0x384   : > { %v402_v38 = vadd.f32 %v398_v37, %v1774_v18  ;;  %v1401_v39 = vpop.f32.mrb[3].mxu0 }
 0x386   : > { %1637 = vtanh.f32 %v402_v38 }
 0x390   : > { %v1638_v40 = vpop.eup %1637 }
 0x391   : > { %1411 = vmatmul.mubr.msk.f32.vlgmr.msra.gmra.mrb[2].mxu1 %vm178_vm3, %v1638_v40 }
 0x464   : > { %v473_v41 = vpop.f32.mrb[2].mxu1 }
 0x465   : > { %v477_v42 = vadd.f32 %v473_v41, %v1774_v18  ;;  %v1412_v43 = vpop.f32.mrb[3].mxu1 }
 0x467   : > { %1639 = vtanh.f32 %v477_v42 }
 0x471   : > { %v1640_v44 = vpop.eup %1639  }
 0x472   : > { %v480_v45 = vsub.f32 %v1640_v44, %v1667_v24  ;;  %v1961_v24 = vmov %v1640_v44 }
 0x474   : > { %v481_v46 = vand.u32 2147483647, %v480_v45 }
 0x476   : > { %v482_v47 = vsel %vm178_vm3, %v481_v46, -inf }
 0x477   : > { %483 = vmax.xlane.f32.xlu0 %v482_v47 }
 0x504   : > { %v484_v48 = vpop.xlane.xlu0 %483 }
 0x505   : > { %v485_v49 = vrot.slane %v484_v48, 4 }
 0x507   : > { %v486_v50 = vmax.f32 %v484_v48, %v485_v49 }
 0x509   : > { %v487_v51 = vrot.slane %v486_v50, 2 }
 0x50b   : > { %v488_v52 = vmax.f32 %v486_v50, %v487_v51 }
 0x50d   : > { %v489_v53 = vrot.slane %v488_v52, 1 }
 0x50f   : > { %v490_v54 = vmax.f32 %v488_v52, %v489_v53 }
 0x511   : > { %1609 = vpush %v490_v54 }
 0x542   : > { %s1610_s21 = spop %1609 }
 0x543   : > { %p173_p1 = scmp.gt.f32.partialorder %s1610_s21, 0.0001 }
 0x545   : > { %p174_p2 = pnand %p173_p1, %p172_p0 }
 0x546   :  { %v1676_v55 = vmov (%p174_p2), 0.0|0.0   ;;  %vm1677_vm4 = vmmov (%p174_p2), 0   ;;  %v1678_v56 = vmov (%p174_p2), 0.0   ;;  %v1094_v13 = vld [vmem:[%s1957_s3] sm:$0xff] (%p174_p2)  ;;  %v1095_v14 = vld [vmem:[%s1957_s3 + $0x8] sm:$0xff] (%p174_p2)  ;;  %vm1211_vm5 = vcmask (%p174_p2), 15360  }
 0x547   :  { %177 = sbr.rel (!%p174_p2) target bundleno = 229 (0xe5), region = 51  ;;  %1549 = vmatprep.subr.bf16.mxu1 (%p174_p2), %v1676_v55  ;;  %1421 = vmatprep.mubr.msk.f32.mxu1 (%p174_p2), %vm1677_vm4, %v1678_v56  ;;  %v1597_v15 = vpack.c.bf16 (%p174_p2), %v1095_v14, %v1094_v13  ;;  %v1098_v31 = vld [vmem:[%s1957_s3 + $0x20] sm:$0xff] (%p174_p2) }
 0x548   :  { %1551 = vmatpush3.bf16.msra.mxu1 (%p174_p2), %v1796_v25  ;;  %1561 = vmatprep.subr.bf16.mxu0 (%p174_p2), %v1676_v55 }
 0x549   :  { %1552 = vmatprep.subr.bf16.mxu1 (%p174_p2), %v1676_v55  ;;  %1563 = vmatpush3.bf16.msra.mxu0 (%p174_p2), %v1796_v25 }
 0x54a   :  { %1564 = vmatprep.subr.bf16.mxu0 (%p174_p2), %v1676_v55  ;;  %1443 = vmatprep.mubr.msk.f32.mxu0 (%p174_p2), %vm1677_vm4, %v1678_v56 }
 0x54c   :  { %1554 = vmatpush3.bf16.msra.mxu1 (%p174_p2), %v1801_v27 }
 0x54d   :  { %1555 = vmatprep.subr.bf16.mxu1 (%p174_p2), %v1676_v55  ;;  %1566 = vmatpush3.bf16.msra.mxu0 (%p174_p2), %v1801_v27 }
 0x54e   :  { %1573 = vmatprep.subr.bf16.mxu0 %v1676_v55 }
 0x54f   :  { %1422 = vmatmul.mubr.msk.f32.vlgmr.msra.gmra.mrb[0].mxu1 %vm178_vm3, %v1640_v44 }
 0x550   :  { %1557 = vmatpush3.bf16.msra.mxu1 %v1796_v25  ;;  %1432 = vmatprep.mubr.msk.f32.mxu1 %vm1677_vm4, %v1678_v56 }
 0x551   :  { %1558 = vmatprep.subr.bf16.mxu1 %v1676_v55 }
 0x554   :  { %1560 = vmatpush3.bf16.msra.mxu1 %v1801_v27 }
 0x555   :  { %1567 = vmatprep.subr.bf16.mxu1 %v1676_v55 }
 0x622   :  { %v562_v57 = vpop.f32.mrb[0].mxu1 }
 0x623   :  { %v566_v58 = vadd.f32 %v562_v57, %v1774_v18  ;;  %v1423_v59 = vpop.f32.mrb[1].mxu1 }
 0x625   :  { %1641 = vtanh.f32 %v566_v58 }
 0x62f   :  { %v1850_v60 = vpop.eup %1641 }
 0x630   :  { %1433 = vmatmul.mubr.msk.f32.vlgmr.msra.gmra.mrb[2].mxu1 %vm178_vm3, %v1850_v60 }
 0x631   :  { %1569 = vmatpush3.bf16.msra.mxu1 %v1796_v25  ;;  %1454 = vmatprep.mubr.msk.f32.mxu1 %vm1677_vm4, %v1678_v56 }
 0x632   :  { %1570 = vmatprep.subr.bf16.mxu1 %v1676_v55 }
 0x635   :  { %1572 = vmatpush3.bf16.msra.mxu1 %v1801_v27 }
 0x636   :  { %1579 = vmatprep.subr.bf16.mxu1 %v1676_v55 }
 0x703   :  { %v637_v61 = vpop.f32.mrb[2].mxu1 }
 0x704   :  { %v641_v62 = vadd.f32 %v1770_v16, %v637_v61  ;;  %v1434_v63 = vpop.f32.mrb[3].mxu1 }
 0x706   :  { %1643 = vtanh.f32 %v641_v62 }
 0x710   :  { %v1644_v0 = vpop.eup %1643 }
 0x711   :  { %1444 = vmatmul.mubr.msk.f32.vlgmr.msra.gmra.mrb[0].mxu0 %vm178_vm3, %v1644_v0 }
 0x712   :  { %1575 = vmatpush3.bf16.msra.mxu0 %v1796_v25  ;;  %1465 = vmatprep.mubr.msk.f32.mxu0 %vm1677_vm4, %v1678_v56 }
 0x713   :  { %1576 = vmatprep.subr.bf16.mxu0 %v1676_v55 }
 0x716   :  { %1578 = vmatpush3.bf16.msra.mxu0 %v1801_v27 }
 0x717   :  { %1585 = vmatprep.subr.bf16.mxu0 %v1676_v55 }
 0x7e4   :  { %v712_v1 = vpop.f32.mrb[0].mxu0 }
 0x7e5   :  { %v716_v2 = vadd.f32 %v712_v1, %v1782_v22  ;;  %v1445_v3 = vpop.f32.mrb[1].mxu0  ;;  %v1097_v22 = vld [vmem:[%s1957_s3 + $0x18] sm:$0xff] }
 0x7e7   :  { %1645 = vtanh.f32 %v716_v2 }
 0x7f1   :  { %v1646_v4 = vpop.eup %1645 }
 0x7f2   :  { %1455 = vmatmul.mubr.msk.f32.vlgmr.msra.gmra.mrb[4].mxu1 %vm178_vm3, %v1646_v4 }
 0x7f3   :  { %1581 = vmatpush3.bf16.msra.mxu1 %v1796_v25  ;;  %1476 = vmatprep.mubr.msk.f32.mxu1 %vm1677_vm4, %v1678_v56 }
 0x7f4   :  { %1582 = vmatprep.subr.bf16.mxu1 %v1676_v55 }
 0x7f7   :  { %1584 = vmatpush3.bf16.msra.mxu1 %v1801_v27 }
 0x7f8   :  { %1591 = vmatprep.subr.bf16.mxu1 %v1676_v55 }
 0x8c5   :  { %v787_v5 = vpop.f32.mrb[4].mxu1 }
 0x8c6   :  { %v791_v6 = vadd.f32 %v1778_v20, %v787_v5  ;;  %v1456_v7 = vpop.f32.mrb[5].mxu1  ;;  %v1096_v20 = vld [vmem:[%s1957_s3 + $0x10] sm:$0xff] }
 0x8c7   :  { %v1601_v24 = vpack.c.bf16 %v1097_v22, %v1096_v20 }
 0x8c8   :  { %1647 = vtanh.f32 %v791_v6 }
 0x8d2   :  { %v1648_v8 = vpop.eup %1647 }
 0x8d3   :  { %1466 = vmatmul.mubr.msk.f32.vlgmr.msra.gmra.mrb[2].mxu0 %vm178_vm3, %v1648_v8 }
 0x8d4   :  { %1587 = vmatpush3.bf16.msra.mxu0 %v1796_v25  ;;  %1487 = vmatprep.mubr.msk.f32.mxu0 %vm1677_vm4, %v1678_v56 }
 0x8d5   :  { %1588 = vmatprep.subr.bf16.mxu0 %v1676_v55 }
 0x8d8   :  { %1590 = vmatpush3.bf16.msra.mxu0 %v1801_v27 }
 0x8d9   :  { %1598 = vmatprep.subr.bf16.mxu0 %v1597_v15 }
 0x9a6   :  { %v862_v9 = vpop.f32.mrb[2].mxu0 }
 0x9a7   :  { %v866_v10 = vadd.f32 %v862_v9, %v1776_v19  ;;  %v1467_v11 = vpop.f32.mrb[3].mxu0 }
 0x9a9   :  { %1649 = vtanh.f32 %v866_v10 }
 0x9b3   :  { %v1650_v12 = vpop.eup %1649 }
 0x9b4   :  { %1477 = vmatmul.mubr.msk.f32.vlgmr.msra.gmra.mrb[6].mxu1 %vm178_vm3, %v1650_v12 }
 0x9b5   :  { %1593 = vmatpush3.bf16.msra.mxu1 %v1796_v25  ;;  %1498 = vmatprep.mubr.msk.f32.mxu1 %vm1677_vm4, %v1678_v56 }
 0x9b6   :  { %1594 = vmatprep.subr.bf16.mxu1 %v1676_v55 }
 0x9b9   :  { %1596 = vmatpush3.bf16.msra.mxu1 %v1801_v27 }
 0xa87   :  { %v937_v16 = vpop.f32.mrb[6].mxu1 }
 0xa88   :  { %v941_v18 = vadd.f32 %v1772_v17, %v937_v16  ;;  %v1478_v19 = vpop.f32.mrb[7].mxu1  ;;  %v1099_v17 = vlaneseq }
 0xa8a   :  { %1651 = vtanh.f32 %v941_v18  ;;  %v1100_v26 = vshrl.u32 %v1099_v17, 7 }
 0xa8c   :  { %v1101_v30 = vsub.s32 0, %v1100_v26 }
 0xa8e   :  { %v1102_v32 = vrot.slane %v1098_v31, %v1101_v30 }
 0xa94   :  { %v1652_v25 = vpop.eup %1651 }
 0xa95   :  { %1488 = vmatmul.mubr.msk.f32.vlgmr.msra.gmra.mrb[4].mxu0 %vm178_vm3, %v1652_v25 }
 0xa96   :  { %1600 = vmatpush3.bf16.msra.mxu0 %v1597_v15  ;;  %1509 = vmatprep.mubr.msk.f32.mxu0 %vm178_vm3, %v1850_v60 }
 0xa97   :  { %1602 = vmatprep.subr.bf16.mxu0 %v1601_v24 }
 0xa9a   :  { %1604 = vmatpush3.bf16.msra.mxu0 %v1601_v24 }
 0xa9d   :  { %1510 = vmatmul.mubr.msk.f32.vlgmr.msra.gmra.mrb[6].mxu0 %vm178_vm3, %v1644_v0 }
 0xa9e   :  { %1512 = vmatprep.mubr.msk.f32.mxu0 %vm178_vm3, %v1646_v4 }
 0xaa1   :  { %1513 = vmatmul.mubr.msk.f32.gmra.mrb[8].mxu0 %vm178_vm3, %v1648_v8 }
 0xaa2   :  { %1515 = vmatprep.mubr.msk.f32.mxu0 %vm178_vm3, %v1650_v12 }
 0xaa5   :  { %1516 = vmatmul.mubr.msk.f32.gmra.mrb[10].mxu0 %vm178_vm3, %v1652_v25 }
 0xb68   :  { %v1012_v27 = vpop.f32.mrb[4].mxu0 }
 0xb69   :  { %v1016_v28 = vadd.f32 %v1012_v27, %v1784_v23  ;;  %v1489_v29 = vpop.f32.mrb[5].mxu0 }
 0xb6b   :  { %1653 = vtanh.f32 %v1016_v28 }
 0xb70   :  { %v1511_v33 = vpop.f32.mrb[6].mxu0 }
 0xb71   :  { %v1178_v34 = vadd.f32 %v1511_v33, %v1102_v32  ;;  %v1172_v35 = vpop.f32.mrb[7].mxu0 }
 0xb72   :  { %v1173_v36 = vadd.f32 %v1172_v35, %v1102_v32 }
 0xb73   :  { %1213 = vst.msk [vmem:[%s1958_s4 + $0x8] sm:$0xff] %vm1211_vm5, %v1178_v34 }
 0xb74   :  { %1212 = vst.msk [vmem:[%s1958_s4] sm:$0xff] %vm1211_vm5, %v1173_v36  ;;  %v1514_v23 = vpop.f32.mrb[8].mxu0 }
 0xb75   :  { %v1654_v37 = vpop.eup %1653  ;;  %v1188_v38 = vadd.f32 %v1514_v23, %v1102_v32  ;;  %v1182_v39 = vpop.f32.mrb[9].mxu0 }
 0xb76   :  { %v1183_v40 = vadd.f32 %v1182_v39, %v1102_v32  ;;  %1499 = vmatmul.mubr.msk.f32.vlgmr.msra.gmra.mrb[8].mxu1 %vm178_vm3, %v1654_v37  ;;  %1518 = vmatprep.mubr.msk.f32.mxu0 %vm178_vm3, %v1654_v37 }
 0xb77   :  { %1215 = vst.msk [vmem:[%s1958_s4 + $0x18] sm:$0xff] %vm1211_vm5, %v1188_v38 }
 0xb78   :  { %1214 = vst.msk [vmem:[%s1958_s4 + $0x10] sm:$0xff] %vm1211_vm5, %v1183_v40  ;;  %v1517_v41 = vpop.f32.mrb[10].mxu0 }
 0xb79   :  { %v1198_v42 = vadd.f32 %v1517_v41, %v1102_v32  ;;  %v1192_v43 = vpop.f32.mrb[11].mxu0 }
 0xb7a   :  { %v1193_v44 = vadd.f32 %v1192_v43, %v1102_v32 }
 0xb7b   :  { %1217 = vst.msk [vmem:[%s1958_s4 + $0x28] sm:$0xff] %vm1211_vm5, %v1198_v42 }
 0xb7c   :  { %1216 = vst.msk [vmem:[%s1958_s4 + $0x20] sm:$0xff] %vm1211_vm5, %v1193_v44 }
 0xc49   :  { %v1087_v45 = vpop.f32.mrb[8].mxu1 }
 0xc4a   :  { %v1091_v46 = vadd.f32 %v1780_v21, %v1087_v45  ;;  %v1500_v47 = vpop.f32.mrb[9].mxu1 }
 0xc4c   :  { %1655 = vtanh.f32 %v1091_v46 }
 0xc56   :  { %v1656_v48 = vpop.eup %1655 }
 0xc57   :  { %1093 = vst.msk [vmem:[%s1959_s5] sm:$0xff] %vm178_vm3, %v1656_v48  ;;  %1519 = vmatmul.mubr.msk.f32.gmra.mrb[12].mxu0 %vm178_vm3, %v1656_v48 }
 0xd2a   :  { %v1520_v49 = vpop.f32.mrb[12].mxu0 }
 0xd2b   :  { %v1208_v50 = vadd.f32 %v1520_v49, %v1102_v32  ;;  %v1202_v51 = vpop.f32.mrb[13].mxu0 }
 0xd2c   :  { %v1203_v52 = vadd.f32 %v1202_v51, %v1102_v32 }
 0xd2d   :  { %1219 = vst.msk [vmem:[%s1958_s4 + $0x38] sm:$0xff] %vm1211_vm5, %v1208_v50 }
 0xd2e   :  { %1218 = vst.msk [vmem:[%s1958_s4 + $0x30] sm:$0xff] %vm1211_vm5, %v1203_v52 }

</bundles_post_ra>
